<compile_context>
chip_gen: v5e
topology: v5e:2x2
jax: 0.10.0
libtpu: 0.0.40
codegen_flags: <defaults>
</compile_context>

<pallas_src>
import functools

import jax
import jax.numpy as jnp
from jax import lax
from jax.experimental import pallas as pl
from jax.experimental.pallas import tpu as pltpu


def _cross_attn_kernel(x_ref, t_ref, wq_ref, bq_ref, wkv_ref, bkv_ref, o_ref,
                       *, num_heads, head_dim, nb):
    """Processes `nb` batch elements per invocation.

    x_ref:   (nb, C, HW)       bf16  channel-major image tokens
    t_ref:   (nb, L, text_dim) bf16
    wq_ref:  (C, C)            bf16  (scale folded in)
    bq_ref:  (C, 1)            f32   (scale folded in)
    wkv_ref: (2C, text_dim)    bf16  fused k/v projection
    bkv_ref: (2C, 1)           f32
    o_ref:   (nb, C, HW)       f32
    """
    C = num_heads * head_dim
    wq = wq_ref[...]
    wkv = wkv_ref[...]
    bq = bq_ref[...]
    bkv = bkv_ref[...]

    for b in range(nb):                           # static unrolled (nb in {1, B})
        xb = x_ref[b]                             # (C, HW)   bf16
        tb = t_ref[b]                             # (L, Td)   bf16

        # q = (scale*Wq) @ x + scale*bq -> (C, HW), f32 accumulate on the MXU.
        q = jnp.dot(wq, xb, preferred_element_type=jnp.float32) + bq

        # Fused kv = Wkv @ text^T + bkv -> (2C, L); dot_general contracts the
        # text_dim axes of both operands (no explicit transpose).
        kv = lax.dot_general(wkv, tb, (((1,), (1,)), ((), ())),
                             preferred_element_type=jnp.float32) + bkv
        k = kv[:C]                                # (C, L)  sublane slice (row C, 8-aligned)
        v = kv[C:]                                # (C, L)

        hw = q.shape[-1]
        L = k.shape[-1]

        # Heads axis as a batch dim: (H, dh, .) — pure sublane grouping since
        # head_dim is a multiple of the sublane tile.
        q3 = q.astype(jnp.bfloat16).reshape(num_heads, head_dim, hw)
        k3 = k.astype(jnp.bfloat16).reshape(num_heads, head_dim, L)
        v3 = v.astype(jnp.bfloat16).reshape(num_heads, head_dim, L)

        # S[h, l, p] = sum_d k3[h,d,l] * q3[h,d,p]  -> (H, L, HW); scale folded.
        s = lax.dot_general(k3, q3, (((1,), (1,)), ((0,), (0,))),
                            preferred_element_type=jnp.float32)

        # Numerically-stable softmax over the key axis (axis=1), single pass
        # over the whole (H, L, HW) tensor, f32 math.
        s = s - jnp.max(s, axis=1, keepdims=True)
        p = jnp.exp(s)
        p = p * pl.reciprocal(jnp.sum(p, axis=1, keepdims=True), approx=True)
        # dropout: identity (eval mode)

        # O[h, d, p] = sum_l v3[h,d,l] * P[h,l,p] -> (H, dh, HW); reshape to
        # (C, HW) is a pure sublane stacking matching the torch concat order
        # (channel c = h*dh + d), stored as one full lane-dense block.
        o = lax.dot_general(v3, p.astype(jnp.bfloat16), (((2,), (1,)), ((0,), (0,))),
                            preferred_element_type=jnp.float32)
        o_ref[b] = o.reshape(C, hw).astype(o_ref.dtype)


def prepare_params(params, *, num_heads):
    """One-time parameter prep (do this at model init, not per forward)."""
    C = params["wq"].shape[0]
    dh = C // num_heads
    scale = float(dh) ** (-0.5)
    return {
        "wq": (params["wq"] * scale).astype(jnp.bfloat16),       # (C, C), scale folded
        "bq": (params["bq"] * scale).reshape(C, 1).astype(jnp.float32),
        "wkv": params["wkv"].astype(jnp.bfloat16),                # (2C, text_dim), fused
        "bkv": params["bkv"].reshape(2 * C, 1).astype(jnp.float32),
    }


@functools.partial(jax.jit, static_argnames=("num_heads", "fold_batch"))
def cross_attention_multi_head(x, text_emb, prepared, *, num_heads, fold_batch=True):
    """x: (B, C, H, W) f32, text_emb: (B, L, text_dim) f32 -> (B, C, H, W) f32."""
    B, C, H, W = x.shape
    HW = H * W
    L, text_dim = text_emb.shape[1], text_emb.shape[2]
    dh = C // num_heads

    # How many batch elements per kernel invocation:
    #   single-TC chips (v5e/v6e): whole batch in one grid step (fold).
    #   multi-TC chips (v7x): one per step, "parallel" axis -> megacore shards it.
    nb = B if fold_batch else 1

    # NCHW -> (B, C, HW): pure reshape, no transpose; bf16 halves DMA bytes.
    x_cm = x.reshape(B, C, HW).astype(jnp.bfloat16)
    t_bf = text_emb.astype(jnp.bfloat16)

    kernel = functools.partial(_cross_attn_kernel,
                               num_heads=num_heads, head_dim=dh, nb=nb)

    out_cm = pl.pallas_call(
        kernel,
        out_shape=jax.ShapeDtypeStruct((B, C, HW), x.dtype),
        grid_spec=pltpu.PrefetchScalarGridSpec(
            num_scalar_prefetch=0,
            grid=(B // nb,),
            in_specs=[
                pl.BlockSpec((nb, C, HW), lambda i: (i, 0, 0)),           # x (channel-major)
                pl.BlockSpec((nb, L, text_dim), lambda i: (i, 0, 0)),     # text_emb
                pl.BlockSpec((C, C), lambda i: (0, 0)),                   # scale*Wq
                pl.BlockSpec((C, 1), lambda i: (0, 0)),                   # scale*bq
                pl.BlockSpec((2 * C, text_dim), lambda i: (0, 0)),        # fused Wkv
                pl.BlockSpec((2 * C, 1), lambda i: (0, 0)),               # fused bkv
            ],
            out_specs=pl.BlockSpec((nb, C, HW), lambda i: (i, 0, 0)),     # lane-dense output
        ),
        compiler_params=pltpu.CompilerParams(
            dimension_semantics=("parallel",)),                           # megacore on multi-TC
    )(x_cm, t_bf, prepared["wq"], prepared["bq"], prepared["wkv"], prepared["bkv"])

    # (B, C, HW) -> (B, C, H, W): pure reshape.
    return out_cm.reshape(B, C, H, W)


def _tensorcores_per_chip():
    """Best-effort detection: >1 only on multi-TC chips (v7x). Any failure -> 1."""
    try:
        info = pltpu.get_tpu_info()
        for attr in ("num_cores", "core_count", "num_tensorcores",
                     "tensorcore_count", "cores_per_chip"):
            val = getattr(info, attr, None)
            if val:
                return int(val)
    except Exception:
        pass
    try:
        kind = jax.devices()[0].device_kind.lower()
        if "v7" in kind or "7x" in kind:
            return 2
    except Exception:
        pass
    return 1


def _reference(x, text_emb, params, *, num_heads):
    """Pure-JAX f32 reference mirroring the PyTorch forward (eval mode)."""
    B, C, H, W = x.shape
    HW = H * W
    dh = C // num_heads
    scale = float(dh) ** (-0.5)

    x_flat = jnp.transpose(x, (0, 2, 3, 1)).reshape(B, HW, C)
    q = x_flat @ params["wq"].T + params["bq"]
    kv = text_emb @ params["wkv"].T + params["bkv"]
    k, v = kv[..., :C], kv[..., C:]

    def heads(t):
        return jnp.transpose(t.reshape(B, -1, num_heads, dh), (0, 2, 1, 3))

    qh, kh, vh = heads(q), heads(k), heads(v)
    attn = jnp.einsum("bhqd,bhkd->bhqk", qh, kh) * scale
    attn = jax.nn.softmax(attn, axis=-1)
    out = jnp.einsum("bhqk,bhkd->bhqd", attn, vh)
    out = jnp.transpose(out, (0, 2, 1, 3)).reshape(B, HW, C)
    return jnp.transpose(out, (0, 2, 1)).reshape(B, C, H, W)


if __name__ == "__main__":
    # Shapes consistent with MyAdaptUNet's CA: img_dim = 2*ORIG_C, num_heads = 2.
    B, orig_C = 2, 16
    C = 2 * orig_C                # 32
    H = W = 16
    L, text_dim = 8, 48
    num_heads = 2                 # MyAdaptUNet builds CrossAttentionMultiHead(..., 2)

    key = jax.random.PRNGKey(0)
    kx, kt, k1, k2, k3, k4 = jax.random.split(key, 6)

    x = jax.random.normal(kx, (B, C, H, W), dtype=jnp.float32)
    text_emb = jax.random.normal(kt, (B, L, text_dim), dtype=jnp.float32)

    params = {
        "wq": 0.05 * jax.random.normal(k1, (C, C), dtype=jnp.float32),            # (out, in) like torch
        "bq": 0.01 * jax.random.normal(k2, (C,), dtype=jnp.float32),
        "wkv": 0.05 * jax.random.normal(k3, (2 * C, text_dim), dtype=jnp.float32),
        "bkv": 0.01 * jax.random.normal(k4, (2 * C,), dtype=jnp.float32),
    }

    # One-time prep (scale folding, bf16 casts) — hoisted out of the hot path.
    prepared = prepare_params(params, num_heads=num_heads)

    # Fold the batch on single-TC chips; keep the parallel batch grid on v7x.
    fold = _tensorcores_per_chip() <= 1

    out = cross_attention_multi_head(x, text_emb, prepared,
                                     num_heads=num_heads, fold_batch=fold)
    out = jax.block_until_ready(out)

    ref = _reference(x, text_emb, params, num_heads=num_heads)
    assert out.shape == (B, C, H, W)
    # Tolerance covers bf16 MXU operands + pl.reciprocal(approx=True) vs the f32 reference.
    assert jnp.allclose(out, ref, atol=3e-2, rtol=3e-2), (
        "mismatch vs reference, max abs diff = %f" % float(jnp.max(jnp.abs(out - ref))))

    print("KERNEL_OK")
</pallas_src>

<mosaic_0001>
module attributes {stable_mosaic.version = 11 : i64} {
  func.func @_cross_attn_kernel(%arg0: i32, %arg1: memref<2x32x256xbf16, #tpu.memory_space<vmem>>, %arg2: memref<2x8x48xbf16, #tpu.memory_space<vmem>>, %arg3: memref<32x32xbf16, #tpu.memory_space<vmem>>, %arg4: memref<32x1xf32, #tpu.memory_space<vmem>>, %arg5: memref<64x48xbf16, #tpu.memory_space<vmem>>, %arg6: memref<64x1xf32, #tpu.memory_space<vmem>>, %arg7: memref<2x32x256xf32, #tpu.memory_space<vmem>>) attributes {dimension_semantics = [#tpu.dimension_semantics<parallel>], iteration_bounds = array<i64: 1>, scalar_prefetch = 0 : i64, scratch_operands = 0 : i64, tpu.core_type = #tpu.core_type<tc>, window_params = [{transform_indices = @transform_0, window_bounds = array<i64: 2, 32, 256>}, {transform_indices = @transform_1, window_bounds = array<i64: 2, 8, 48>}, {pipeline_mode = #tpu.pipeline_mode<synchronous>, transform_indices = @transform_2, window_bounds = array<i64: 32, 32>}, {pipeline_mode = #tpu.pipeline_mode<synchronous>, transform_indices = @transform_3, window_bounds = array<i64: 32, 1>}, {pipeline_mode = #tpu.pipeline_mode<synchronous>, transform_indices = @transform_4, window_bounds = array<i64: 64, 48>}, {pipeline_mode = #tpu.pipeline_mode<synchronous>, transform_indices = @transform_5, window_bounds = array<i64: 64, 1>}, {transform_indices = @transform_6, window_bounds = array<i64: 2, 32, 256>}]} {
    %c0 = arith.constant 0 : index
    %c0_0 = arith.constant 0 : index
    %0 = vector.load %arg3[%c0, %c0_0] : memref<32x32xbf16, #tpu.memory_space<vmem>>, vector<32x32xbf16>
    %c0_1 = arith.constant 0 : index
    %c0_2 = arith.constant 0 : index
    %1 = vector.load %arg5[%c0_1, %c0_2] : memref<64x48xbf16, #tpu.memory_space<vmem>>, vector<64x48xbf16>
    %c0_3 = arith.constant 0 : index
    %c0_4 = arith.constant 0 : index
    %2 = vector.load %arg4[%c0_3, %c0_4] : memref<32x1xf32, #tpu.memory_space<vmem>>, vector<32x1xf32>
    %c0_5 = arith.constant 0 : index
    %c0_6 = arith.constant 0 : index
    %3 = vector.load %arg6[%c0_5, %c0_6] : memref<64x1xf32, #tpu.memory_space<vmem>>, vector<64x1xf32>
    %c0_7 = arith.constant 0 : index
    %c0_8 = arith.constant 0 : index
    %c0_9 = arith.constant 0 : index
    %4 = vector.load %arg1[%c0_7, %c0_8, %c0_9] : memref<2x32x256xbf16, #tpu.memory_space<vmem>>, vector<1x32x256xbf16>
    %5 = vector.shape_cast %4 : vector<1x32x256xbf16> to vector<32x256xbf16>
    %c0_10 = arith.constant 0 : index
    %c0_11 = arith.constant 0 : index
    %c0_12 = arith.constant 0 : index
    %6 = vector.load %arg2[%c0_10, %c0_11, %c0_12] : memref<2x8x48xbf16, #tpu.memory_space<vmem>>, vector<1x8x48xbf16>
    %7 = vector.shape_cast %6 : vector<1x8x48xbf16> to vector<8x48xbf16>
    %cst = arith.constant dense<0.000000e+00> : vector<32x256xf32>
    %8 = tpu.matmul %0, %5, %cst {dimension_numbers = #tpu.dot_dimension_numbers<[1], [0], [0], [1], [0, 0, 1, 1], [], []>} : vector<32x32xbf16>, vector<32x256xbf16>, vector<32x256xf32> -> vector<32x256xf32>
    %9 = vector.broadcast %2 : vector<32x1xf32> to vector<32x256xf32>
    %10 = arith.addf %8, %9 : vector<32x256xf32>
    %cst_13 = arith.constant dense<0.000000e+00> : vector<64x8xf32>
    %11 = tpu.matmul %1, %7, %cst_13 {dimension_numbers = #tpu.dot_dimension_numbers<[1], [1], [0], [0], [0, 0, 1, 0], [], []>} : vector<64x48xbf16>, vector<8x48xbf16>, vector<64x8xf32> -> vector<64x8xf32>
    %12 = vector.broadcast %3 : vector<64x1xf32> to vector<64x8xf32>
    %13 = arith.addf %11, %12 : vector<64x8xf32>
    %14 = vector.extract_strided_slice %13 {offsets = [0, 0], sizes = [32, 8], strides = [1, 1]} : vector<64x8xf32> to vector<32x8xf32>
    %15 = vector.extract_strided_slice %13 {offsets = [32, 0], sizes = [32, 8], strides = [1, 1]} : vector<64x8xf32> to vector<32x8xf32>
    %16 = arith.truncf %10 : vector<32x256xf32> to vector<32x256xbf16>
    %17 = vector.shape_cast %16 : vector<32x256xbf16> to vector<2x16x256xbf16>
    %18 = arith.truncf %14 : vector<32x8xf32> to vector<32x8xbf16>
    %19 = vector.shape_cast %18 : vector<32x8xbf16> to vector<2x16x8xbf16>
    %20 = arith.truncf %15 : vector<32x8xf32> to vector<32x8xbf16>
    %21 = vector.shape_cast %20 : vector<32x8xbf16> to vector<2x16x8xbf16>
    %cst_14 = arith.constant dense<0.000000e+00> : vector<2x8x256xf32>
    %22 = tpu.matmul %19, %17, %cst_14 {dimension_numbers = #tpu.dot_dimension_numbers<[1], [1], [2], [2], [0, 0, 0, 2, 1, 2], [0], [0]>} : vector<2x16x8xbf16>, vector<2x16x256xbf16>, vector<2x8x256xf32> -> vector<2x8x256xf32>
    %cst_15 = arith.constant dense<0xFF800000> : vector<2x256xf32>
    %23 = vector.multi_reduction <maximumf>, %22, %cst_15 [1] : vector<2x8x256xf32> to vector<2x256xf32>
    %24 = vector.shape_cast %23 : vector<2x256xf32> to vector<2x1x256xf32>
    %25 = vector.broadcast %24 : vector<2x1x256xf32> to vector<2x8x256xf32>
    %26 = arith.subf %22, %25 : vector<2x8x256xf32>
    %27 = math.exp %26 : vector<2x8x256xf32>
    %cst_16 = arith.constant dense<0.000000e+00> : vector<2x256xf32>
    %28 = vector.multi_reduction <add>, %27, %cst_16 [1] : vector<2x8x256xf32> to vector<2x256xf32>
    %29 = vector.shape_cast %28 : vector<2x256xf32> to vector<2x1x256xf32>
    %30 = tpu.reciprocal %29 {approx = true} : vector<2x1x256xf32> -> vector<2x1x256xf32>
    %31 = vector.broadcast %30 : vector<2x1x256xf32> to vector<2x8x256xf32>
    %32 = arith.mulf %27, %31 : vector<2x8x256xf32>
    %33 = arith.truncf %32 : vector<2x8x256xf32> to vector<2x8x256xbf16>
    %cst_17 = arith.constant dense<0.000000e+00> : vector<2x16x256xf32>
    %34 = tpu.matmul %21, %33, %cst_17 {dimension_numbers = #tpu.dot_dimension_numbers<[2], [1], [1], [2], [0, 0, 0, 1, 1, 2], [0], [0]>} : vector<2x16x8xbf16>, vector<2x8x256xbf16>, vector<2x16x256xf32> -> vector<2x16x256xf32>
    %35 = vector.shape_cast %34 : vector<2x16x256xf32> to vector<32x256xf32>
    %c0_18 = arith.constant 0 : index
    %c0_19 = arith.constant 0 : index
    %c0_20 = arith.constant 0 : index
    %36 = vector.load %arg7[%c0_18, %c0_19, %c0_20] : memref<2x32x256xf32, #tpu.memory_space<vmem>>, vector<1x32x256xf32>
    %37 = vector.shape_cast %36 : vector<1x32x256xf32> to vector<32x256xf32>
    %38 = vector.shape_cast %35 : vector<32x256xf32> to vector<1x32x256xf32>
    tpu.vector_store %arg7[%c0_18, %c0_19, %c0_20], %38 {strides = array<i32>} : memref<2x32x256xf32, #tpu.memory_space<vmem>>, vector<1x32x256xf32>,
    %c1 = arith.constant 1 : index
    %c0_21 = arith.constant 0 : index
    %c0_22 = arith.constant 0 : index
    %39 = vector.load %arg1[%c1, %c0_21, %c0_22] : memref<2x32x256xbf16, #tpu.memory_space<vmem>>, vector<1x32x256xbf16>
    %40 = vector.shape_cast %39 : vector<1x32x256xbf16> to vector<32x256xbf16>
    %c1_23 = arith.constant 1 : index
    %c0_24 = arith.constant 0 : index
    %c0_25 = arith.constant 0 : index
    %41 = vector.load %arg2[%c1_23, %c0_24, %c0_25] : memref<2x8x48xbf16, #tpu.memory_space<vmem>>, vector<1x8x48xbf16>
    %42 = vector.shape_cast %41 : vector<1x8x48xbf16> to vector<8x48xbf16>
    %cst_26 = arith.constant dense<0.000000e+00> : vector<32x256xf32>
    %43 = tpu.matmul %0, %40, %cst_26 {dimension_numbers = #tpu.dot_dimension_numbers<[1], [0], [0], [1], [0, 0, 1, 1], [], []>} : vector<32x32xbf16>, vector<32x256xbf16>, vector<32x256xf32> -> vector<32x256xf32>
    %44 = vector.broadcast %2 : vector<32x1xf32> to vector<32x256xf32>
    %45 = arith.addf %43, %44 : vector<32x256xf32>
    %cst_27 = arith.constant dense<0.000000e+00> : vector<64x8xf32>
    %46 = tpu.matmul %1, %42, %cst_27 {dimension_numbers = #tpu.dot_dimension_numbers<[1], [1], [0], [0], [0, 0, 1, 0], [], []>} : vector<64x48xbf16>, vector<8x48xbf16>, vector<64x8xf32> -> vector<64x8xf32>
    %47 = vector.broadcast %3 : vector<64x1xf32> to vector<64x8xf32>
    %48 = arith.addf %46, %47 : vector<64x8xf32>
    %49 = vector.extract_strided_slice %48 {offsets = [0, 0], sizes = [32, 8], strides = [1, 1]} : vector<64x8xf32> to vector<32x8xf32>
    %50 = vector.extract_strided_slice %48 {offsets = [32, 0], sizes = [32, 8], strides = [1, 1]} : vector<64x8xf32> to vector<32x8xf32>
    %51 = arith.truncf %45 : vector<32x256xf32> to vector<32x256xbf16>
    %52 = vector.shape_cast %51 : vector<32x256xbf16> to vector<2x16x256xbf16>
    %53 = arith.truncf %49 : vector<32x8xf32> to vector<32x8xbf16>
    %54 = vector.shape_cast %53 : vector<32x8xbf16> to vector<2x16x8xbf16>
    %55 = arith.truncf %50 : vector<32x8xf32> to vector<32x8xbf16>
    %56 = vector.shape_cast %55 : vector<32x8xbf16> to vector<2x16x8xbf16>
    %cst_28 = arith.constant dense<0.000000e+00> : vector<2x8x256xf32>
    %57 = tpu.matmul %54, %52, %cst_28 {dimension_numbers = #tpu.dot_dimension_numbers<[1], [1], [2], [2], [0, 0, 0, 2, 1, 2], [0], [0]>} : vector<2x16x8xbf16>, vector<2x16x256xbf16>, vector<2x8x256xf32> -> vector<2x8x256xf32>
    %cst_29 = arith.constant dense<0xFF800000> : vector<2x256xf32>
    %58 = vector.multi_reduction <maximumf>, %57, %cst_29 [1] : vector<2x8x256xf32> to vector<2x256xf32>
    %59 = vector.shape_cast %58 : vector<2x256xf32> to vector<2x1x256xf32>
    %60 = vector.broadcast %59 : vector<2x1x256xf32> to vector<2x8x256xf32>
    %61 = arith.subf %57, %60 : vector<2x8x256xf32>
    %62 = math.exp %61 : vector<2x8x256xf32>
    %cst_30 = arith.constant dense<0.000000e+00> : vector<2x256xf32>
    %63 = vector.multi_reduction <add>, %62, %cst_30 [1] : vector<2x8x256xf32> to vector<2x256xf32>
    %64 = vector.shape_cast %63 : vector<2x256xf32> to vector<2x1x256xf32>
    %65 = tpu.reciprocal %64 {approx = true} : vector<2x1x256xf32> -> vector<2x1x256xf32>
    %66 = vector.broadcast %65 : vector<2x1x256xf32> to vector<2x8x256xf32>
    %67 = arith.mulf %62, %66 : vector<2x8x256xf32>
    %68 = arith.truncf %67 : vector<2x8x256xf32> to vector<2x8x256xbf16>
    %cst_31 = arith.constant dense<0.000000e+00> : vector<2x16x256xf32>
    %69 = tpu.matmul %56, %68, %cst_31 {dimension_numbers = #tpu.dot_dimension_numbers<[2], [1], [1], [2], [0, 0, 0, 1, 1, 2], [0], [0]>} : vector<2x16x8xbf16>, vector<2x8x256xbf16>, vector<2x16x256xf32> -> vector<2x16x256xf32>
    %70 = vector.shape_cast %69 : vector<2x16x256xf32> to vector<32x256xf32>
    %c1_32 = arith.constant 1 : index
    %c0_33 = arith.constant 0 : index
    %c0_34 = arith.constant 0 : index
    %71 = vector.load %arg7[%c1_32, %c0_33, %c0_34] : memref<2x32x256xf32, #tpu.memory_space<vmem>>, vector<1x32x256xf32>
    %72 = vector.shape_cast %71 : vector<1x32x256xf32> to vector<32x256xf32>
    %73 = vector.shape_cast %70 : vector<32x256xf32> to vector<1x32x256xf32>
    tpu.vector_store %arg7[%c1_32, %c0_33, %c0_34], %73 {strides = array<i32>} : memref<2x32x256xf32, #tpu.memory_space<vmem>>, vector<1x32x256xf32>,
    return
  }
  func.func @transform_0(%arg0: i32) -> (i32, i32, i32) {
    %c0_i32 = arith.constant 0 : i32
    %c0_i32_0 = arith.constant 0 : i32
    %c0_i32_1 = arith.constant 0 : i32
    return %arg0, %c0_i32, %c0_i32_0 : i32, i32, i32
  }
  func.func @transform_1(%arg0: i32) -> (i32, i32, i32) {
    %c0_i32 = arith.constant 0 : i32
    %c0_i32_0 = arith.constant 0 : i32
    %c0_i32_1 = arith.constant 0 : i32
    return %arg0, %c0_i32, %c0_i32_0 : i32, i32, i32
  }
  func.func @transform_2(%arg0: i32) -> (i32, i32) {
    %c0_i32 = arith.constant 0 : i32
    %c0_i32_0 = arith.constant 0 : i32
    %c0_i32_1 = arith.constant 0 : i32
    return %c0_i32, %c0_i32_0 : i32, i32
  }
  func.func @transform_3(%arg0: i32) -> (i32, i32) {
    %c0_i32 = arith.constant 0 : i32
    %c0_i32_0 = arith.constant 0 : i32
    %c0_i32_1 = arith.constant 0 : i32
    return %c0_i32, %c0_i32_0 : i32, i32
  }
  func.func @transform_4(%arg0: i32) -> (i32, i32) {
    %c0_i32 = arith.constant 0 : i32
    %c0_i32_0 = arith.constant 0 : i32
    %c0_i32_1 = arith.constant 0 : i32
    return %c0_i32, %c0_i32_0 : i32, i32
  }
  func.func @transform_5(%arg0: i32) -> (i32, i32) {
    %c0_i32 = arith.constant 0 : i32
    %c0_i32_0 = arith.constant 0 : i32
    %c0_i32_1 = arith.constant 0 : i32
    return %c0_i32, %c0_i32_0 : i32, i32
  }
  func.func @transform_6(%arg0: i32) -> (i32, i32, i32) {
    %c0_i32 = arith.constant 0 : i32
    %c0_i32_0 = arith.constant 0 : i32
    %c0_i32_1 = arith.constant 0 : i32
    return %arg0, %c0_i32, %c0_i32_0 : i32, i32, i32
  }
}

</mosaic_0001>

<bundles_post_ra>
// kernel: cross_attention_multi_head.1
= control target key start
LH: loop header
LB: loop body
LE: loop exit
PB: predicated region body
PF: predicated region fallthrough
CT: control target
= control target key end

     0   :  { %vm208_vm0 = vcmask 392192   ;;  %v1121_v1 = vmov 0   ;;  %vm103_vm1 = vcmask 261120   ;;  %vm297_vm2 = vcmask 130048   ;;  %s1447_s1 = inlined_call_operand.vmem [shape: bf16[2,8,48], index: 1, kind: input, shape index: {}]   ;;  %s1448_s5 = inlined_call_operand.vmem [shape: f32[64,1], index: 5, kind: input, shape index: {}]   ;;  %s1449_s0 = inlined_call_operand.vmem [shape: bf16[2,32,256], index: 0, kind: input, shape index: {}]   ;;  %s1450_s4 = inlined_call_operand.vmem [shape: bf16[64,48], index: 4, kind: input, shape index: {}]   ;;  %s1451_s2 = inlined_call_operand.vmem [shape: bf16[32,32], index: 2, kind: input, shape index: {}]   ;;  %s1452_s3 = inlined_call_operand.vmem [shape: f32[32,1], index: 3, kind: input, shape index: {}]   ;;  %s1453_s6 = inlined_call_operand.vmem [shape: f32[2,32,256], index: 6, kind: output, shape index: {}]  }
   0x1   :  { %v52_v0 = vld [vmem:[%s1447_s1] sm:$0xf]  ;;  %1086 = vset.pattern.permute.xlu0 %v1121_v1  ;;  %1088 = vset.pattern.permute.xlu2 %v1121_v1  ;;  %v988_v4 = vld [vmem:[%s1449_s0 + $0x10] sm:$0xf]  ;;  %v1080_v5 = vld [vmem:[%s1449_s0 + $0x14] sm:$0xf0] }
   0x2   :  { %v222_v2 = vsel %vm208_vm0, %v52_v0, 0  ;;  %v40_v3 = vld [vmem:[%s1448_s5] sm:$0xff]  ;;  %1087 = vset.pattern.permute.xlu1 %v1121_v1  ;;  %v1079_v6 = vld [vmem:[%s1449_s0 + $0x14] sm:$0xf]  ;;  %v989_v7 = vor.u32 %v1080_v5, %v988_v4  ;;  %v990_v8 = vld [vmem:[%s1449_s0 + $0x18] sm:$0xf0] }
   0x3   :  { %231 = vmatpush.bf16.xpose.msra.mxu2 %v222_v2  ;;  %150 = vperm.xlu0 %1086, %v40_v3   ;;  %v980_v9 = vld [vmem:[%s1449_s0] sm:$0xf]  ;;  %v1078_v10 = vld [vmem:[%s1449_s0 + $0x4] sm:$0xf0]  ;;  %v993_v11 = vor.u32 %v1079_v6, %v990_v8  ;;  %v1077_v12 = vld [vmem:[%s1449_s0 + $0x4] sm:$0xf] }
   0x4   :  { %v982_v13 = vld [vmem:[%s1449_s0 + $0x8] sm:$0xf0]  ;;  %v1191_v14 = vld [vmem:[%s1450_s4] sm:$0xff]  ;;  %116 = vmatpush.bf16.msra.mxu0 %v989_v7  ;;  %v981_v15 = vor.u32 %v1078_v10, %v980_v9  ;;  %v42_v16 = vld [vmem:[%s1448_s5 + $0x10] sm:$0xff]  ;;  %vm472_vm3 = vcmask 1043456   ;;  %vm468_vm4 = vcmask 64512  }
   0x5   :  { %135 = vmatpush.bf16.msra.mxu1 %v993_v11  ;;  %v985_v17 = vor.u32 %v1077_v12, %v982_v13  ;;  %160 = vperm.xlu2 %1088, %v42_v16   ;;  %v41_v18 = vld [vmem:[%s1448_s5 + $0x8] sm:$0xff]  ;;  %v1202_v19 = vld [vmem:[%s1451_s2] sm:$0xff]  ;;  %v43_v21 = vld [vmem:[%s1448_s5 + $0x18] sm:$0xff] }
   0x6   :  { %v36_v20 = vld [vmem:[%s1452_s3] sm:$0xff]  ;;  %v37_v22 = vld [vmem:[%s1452_s3 + $0x8] sm:$0xff]  ;;  %v39_v23 = vld [vmem:[%s1452_s3 + $0x18] sm:$0xff] }
   0x7   :  { %55 = vperm.xlu1 %1087, %v36_v20   ;;  %v1225_v24 = vld [vmem:[%s1450_s4 + $0x8] sm:$0xff]  ;;  %v38_v26 = vld [vmem:[%s1452_s3 + $0x10] sm:$0xff]  ;;  %v44_v27 = vld [vmem:[%s1448_s5 + $0x20] sm:$0xff] }
   0x8   :  { %117 = vmatpush.bf16.msra.mxu0 %v981_v15  ;;  %v1230_v25 = vld [vmem:[%s1451_s2 + $0x8] sm:$0xff]  ;;  %v1250_v29 = vld [vmem:[%s1450_s4 + $0x10] sm:$0xff]  ;;  %v47_v31 = vld [vmem:[%s1448_s5 + $0x38] sm:$0xff] }
   0x9   :  { %136 = vmatpush.bf16.msra.mxu1 %v985_v17  ;;  %v45_v28 = vld [vmem:[%s1448_s5 + $0x28] sm:$0xff]  ;;  %v46_v30 = vld [vmem:[%s1448_s5 + $0x30] sm:$0xff]  ;;  %v1263_v32 = vld [vmem:[%s1450_s4 + $0x18] sm:$0xff] }
   0xa   :  { %1014 = vmatmul.msk.bf16.vlgmr.msra.gmra.mxu2 %vm208_vm0, %v1191_v14 }
   0xb   :  { %155 = vperm.xlu0 %1086, %v41_v18   ;;  %994 = vmatmul.msk.bf16.vlgmr.msra.gmra.mxu0 %vm103_vm1, %v1202_v19 }
   0xc   :  { %996 = vmatmul.msk.bf16.vlgmr.msra.gmra.mxu1 %vm103_vm1, %v1202_v19 }
   0xd   :  { %165 = vperm.xlu2 %1088, %v43_v21  }
   0xf   :  { %60 = vperm.xlu1 %1087, %v37_v22  }
  0x15   :  { %70 = vperm.xlu2 %1088, %v39_v23  }
  0x17   :  { %65 = vperm.xlu1 %1087, %v38_v26  }
  0x1a   :  { %1015 = vmatmul.msk.bf16.gmra.mxu2 %vm208_vm0, %v1225_v24 }
  0x1b   :  { %995 = vmatmul.msk.bf16.gmra.mxu0 %vm103_vm1, %v1230_v25 }
  0x1c   :  { %997 = vmatmul.msk.bf16.gmra.mxu1 %vm103_vm1, %v1230_v25 }
  0x1d   :  { %170 = vperm.xlu2 %1088, %v44_v27  }
  0x25   :  { %175 = vperm.xlu2 %1088, %v45_v28  }
  0x2a   :  { %1016 = vmatmul.msk.bf16.gmra.mxu2 %vm208_vm0, %v1250_v29 }
  0x2d   :  { %180 = vperm.xlu2 %1088, %v46_v30  }
  0x35   :  { %185 = vperm.xlu2 %1088, %v47_v31  }
  0x3a   :  { %1017 = vmatmul.msk.bf16.gmra.mxu2 %vm208_vm0, %v1263_v32 }
  0x5f   :  { %v1271_v38 = vpop.permute.xlu2 %160 }
  0x67   :  { %v1279_v47 = vpop.permute.xlu2 %165 }
  0x6f   :  { %v1286_v59 = vpop.permute.xlu2 %70 }
  0x75   :  { %v1269_v35 = vpop.permute.xlu0 %150 }
  0x79   :  { %v1267_v33 = vpop.permute.xlu1 %55 }
  0x7d   :  { %v1276_v43 = vpop.permute.xlu0 %155 }
  0x81   :  { %v1273_v39 = vpop.permute.xlu1 %60 }
  0x88   :  { %v119_v34 = vpop.f32.mrf.mxu0 }
  0x89   :  { %v138_v36 = vpop.f32.mrf.mxu1  ;;  %v1281_v53 = vpop.permute.xlu1 %65  ;;  %v120_v7 = vadd.f32 %v119_v34, %v1267_v33 }
  0x8a   :  { %v139_v8 = vadd.f32 %v138_v36, %v1267_v33 }
  0x8c   :  { %v253_v21 = vpack.c.bf16 %v139_v8, %v120_v7 }
  0x8d   :  { %v233_v37 = vpop.f32.mrf.mxu2 }
  0x8e   :  { %v234_v40 = vadd.f32 %v233_v37, %v1269_v35  ;;  %v289_v23 = vunpack.c.l.b16 %v253_v21  ;;  %v290_v27 = vunpack.c.h.b16 %v253_v21 }
  0x90   :  { %v121_v41 = vpop.f32.mrf.mxu0  ;;  %v257_v45 = vpack.c.bf16 %v234_v40, %v234_v40 }
  0x91   :  { %v140_v42 = vpop.f32.mrf.mxu1  ;;  %v122_v9 = vadd.f32 %v121_v41, %v1273_v39 }
  0x92   :  { %v267_v49 = vunpack.c.l.b16 %v257_v45  ;;  %v141_v10 = vadd.f32 %v140_v42, %v1273_v39 }
  0x94   :  { %v254_v22 = vpack.c.bf16 %v141_v10, %v122_v9 }
  0x95   :  { %v235_v44 = vpop.f32.mrf.mxu2 }
  0x96   :  { %v236_v46 = vadd.f32 %v235_v44, %v1276_v43  ;;  %v291_v26 = vunpack.c.l.b16 %v254_v22  ;;  %v292_v28 = vunpack.c.h.b16 %v254_v22 }
  0x98   :  { %v258_v48 = vpack.c.bf16 %v236_v46, %v236_v46  ;;  %v124_v51 = vpop.f32.mrf.mxu0  ;;  %v293_v30 = vpack.c.b16 %v291_v26, %v289_v23  ;;  %v294_v31 = vpack.c.b16 %v292_v28, %v290_v27 }
  0x99   :  { %v143_v52 = vpop.f32.mrf.mxu1  ;;  %v125_v56 = vadd.f32 %v124_v51, %v1281_v53 }
  0x9a   :  { %v268_v50 = vunpack.c.l.b16 %v258_v48  ;;  %v144_v57 = vadd.f32 %v143_v52, %v1281_v53  ;;  %308 = vmatpush.bf16.msra.mxu3 %v293_v30  ;;  %v1301_v30 = vpop.permute.xlu2 %170 }
  0x9c   :  { %v269_v54 = vpack.c.b16 %v268_v50, %v267_v49  ;;  %v255_v61 = vpack.c.bf16 %v144_v57, %v125_v56 }
  0x9d   :  { %v238_v55 = vpop.f32.mrf.mxu2 }
  0x9e   :  { %271 = vxpose.xlu0.c.b16.start.end [1/1] (short) (narrow) %v269_v54, 16  ;;  %v239_v58 = vadd.f32 %v238_v55, %v1271_v38  ;;  %v351_v5 = vunpack.c.l.b16 %v255_v61  ;;  %v352_v6 = vunpack.c.h.b16 %v255_v61  ;;  %321 = vmatpush.bf16.msrb.mxu3 %v294_v31 }
  0xa0   :  { %v126_v60 = vpop.f32.mrf.mxu0  ;;  %v259_v0 = vpack.c.bf16 %v239_v58, %v239_v58 }
  0xa1   :  { %v127_v62 = vadd.f32 %v126_v60, %v1286_v59  ;;  %v145_v63 = vpop.f32.mrf.mxu1 }
  0xa2   :  { %v146_v1 = vadd.f32 %v145_v63, %v1286_v59  ;;  %v329_v11 = vunpack.c.l.b16 %v259_v0 }
  0xa4   :  { %v256_v4 = vpack.c.bf16 %v146_v1, %v127_v62 }
  0xa5   :  { %v240_v2 = vpop.f32.mrf.mxu2 }
  0xa6   :  { %v241_v3 = vadd.f32 %v240_v2, %v1279_v47  ;;  %v353_v13 = vunpack.c.l.b16 %v256_v4  ;;  %v354_v15 = vunpack.c.h.b16 %v256_v4 }
  0xa8   :  { %v260_v12 = vpack.c.bf16 %v241_v3, %v241_v3  ;;  %v356_v17 = vpack.c.b16 %v354_v15, %v352_v6  ;;  %v355_v18 = vpack.c.b16 %v353_v13, %v351_v5 }
  0xaa   :  { %v330_v16 = vunpack.c.l.b16 %v260_v12  ;;  %382 = vmatpush.bf16.msrb.mxu0 %v356_v17 }
  0xac   :  { %v331_v20 = vpack.c.b16 %v330_v16, %v329_v11 }
  0xad   :  { %v243_v23 = vpop.f32.mrf.mxu2 }
  0xae   :  { %333 = vxpose.xlu1.c.b16.start.end [1/1] (short) (narrow) %v331_v20, 16 }
 0x14a   :  { %v279_v34 = vpop.trf.xlu0 }
 0x14b   :  { %1018 = vmatmul.msk.bf16.vlgmr.msra.gmra.mxu3 %vm297_vm2, %v279_v34 }
 0x14c   :  { %369 = vmatpush.bf16.msra.mxu3 %v355_v18 }
 0x15a   :  { %v341_v36 = vpop.trf.xlu1 }
 0x15b   :  { %1019 = vmatmul.msk.bf16.vlgmr.msrb.gmra.mxu3 %vm297_vm2, %v279_v34  ;;  %1021 = vmatmul.msk.bf16.vlgmr.msrb.gmra.mxu0 %vm297_vm2, %v341_v36 }
 0x16b   :  { %1020 = vmatmul.msk.bf16.vlgmr.msra.gmra.mxu3 %vm297_vm2, %v341_v36 }
 0x1ce   :  { %v310_v37 = vpop.f32.mrf.mxu3 }
 0x1cf   :  { %v388_v40 = vrot.slane %v310_v37, 4 }
 0x1d1   :  { %v389_v41 = vmax.f32 %v310_v37, %v388_v40 }
 0x1d3   :  { %v390_v42 = vrot.slane %v389_v41, 2 }
 0x1d5   :  { %v391_v44 = vmax.f32 %v389_v41, %v390_v42 }
 0x1d6   :  { %v312_v45 = vpop.f32.mrf.mxu3 }
 0x1d7   :  { %v392_v46 = vrot.slane %v391_v44, 1 }
 0x1d8   :  { %v384_v48 = vpop.f32.mrf.mxu0 }
 0x1d9   :  { %v393_v49 = vmax.f32 %v391_v44, %v392_v46  ;;  %v406_v50 = vrot.slane %v384_v48, 4 }
 0x1db   :  { %v412_v51 = vsub.f32 %v310_v37, %v393_v49  ;;  %v407_v52 = vmax.f32 %v384_v48, %v406_v50  ;;  %v245_v49 = vpop.f32.mrf.mxu2 }
 0x1dd   :  { %v416_v54 = vmul.f32 1.442695, %v412_v51  ;;  %v408_v55 = vrot.slane %v407_v52, 2 }
 0x1de   :  { %v323_v56 = vpop.f32.mrf.mxu3 }
 0x1df   :  { %1089 = vpow2.f32 %v416_v54  ;;  %v409_v57 = vmax.f32 %v407_v52, %v408_v55  ;;  %v394_v58 = vrot.slane %v323_v56, 4  ;;  %v1305_v52 = vpop.permute.xlu2 %175 }
 0x1e0   :  { %v386_v60 = vpop.f32.mrf.mxu0 }
 0x1e1   :  { %v410_v61 = vrot.slane %v409_v57, 1  ;;  %v395_v62 = vmax.f32 %v323_v56, %v394_v58  ;;  %v246_v58 = vadd.f32 %v245_v49, %v1305_v52 }
 0x1e3   :  { %v411_v63 = vmax.f32 %v409_v57, %v410_v61  ;;  %v396_v0 = vrot.slane %v395_v62, 2 }
 0x1e5   :  { %v1090_v1 = vpop.eup %1089  ;;  %v397_v2 = vmax.f32 %v395_v62, %v396_v0  ;;  %v415_v3 = vsub.f32 %v384_v48, %v411_v63  ;;  %v244_v63 = vadd.f32 %v243_v23, %v1301_v30  ;;  %v1033_v23 = vld [vmem:[%s1449_s0 + $0x20] sm:$0xf] }
 0x1e6   :  { %v325_v4 = vpop.f32.mrf.mxu3  ;;  %v424_v6 = vrot.slane %v1090_v1, 4 }
 0x1e7   :  { %v398_v5 = vrot.slane %v397_v2, 1  ;;  %v422_v8 = vmul.f32 1.442695, %v415_v3  ;;  %v248_v3 = vpop.f32.mrf.mxu2 }
 0x1e8   :  { %v425_v10 = vadd.f32 %v1090_v1, %v424_v6 }
 0x1e9   :  { %v399_v7 = vmax.f32 %v397_v2, %v398_v5  ;;  %1091 = vpow2.f32 %v422_v8  ;;  %v262_v5 = vpack.c.bf16 %v246_v58, %v246_v58  ;;  %v1041_v8 = vld [vmem:[%s1449_s0 + $0x30] sm:$0xf] }
 0x1ea   :  { %v426_v15 = vrot.slane %v425_v10, 2 }
 0x1eb   :  { %v413_v9 = vsub.f32 %v323_v56, %v399_v7  ;;  %v1309_v7 = vpop.permute.xlu2 %180 }
 0x1ec   :  { %v427_v20 = vadd.f32 %v426_v15, %v425_v10 }
 0x1ed   :  { %v418_v11 = vmul.f32 1.442695, %v413_v9  ;;  %v1084_v9 = vld [vmem:[%s1449_s0 + $0x34] sm:$0xf0] }
 0x1ee   :  { %v371_v12 = vpop.f32.mrf.mxu3  ;;  %v428_v34 = vrot.slane %v427_v20, 1 }
 0x1ef   :  { %1093 = vpow2.f32 %v418_v11  ;;  %v400_v13 = vrot.slane %v371_v12, 4  ;;  %v1299_v18 = vpop.eup %1091 }
 0x1f0   :  { %v442_v31 = vrot.slane %v1299_v18, 4  ;;  %v429_v44 = vadd.f32 %v428_v34, %v427_v20 }
 0x1f1   :  { %v401_v16 = vmax.f32 %v371_v12, %v400_v13 }
 0x1f2   :  { %v443_v42 = vadd.f32 %v1299_v18, %v442_v31 }
 0x1f3   :  { %v402_v17 = vrot.slane %v401_v16, 2 }
 0x1f4   :  { %v444_v51 = vrot.slane %v443_v42, 2 }
 0x1f5   :  { %v1094_v21 = vpop.eup %1093  ;;  %v403_v22 = vmax.f32 %v401_v16, %v402_v17  ;;  %v461_v16 = vunpack.c.l.b16 %v262_v5 }
 0x1f6   :  { %v430_v26 = vrot.slane %v1094_v21, 4  ;;  %v373_v27 = vpop.f32.mrf.mxu3  ;;  %v445_v54 = vadd.f32 %v444_v51, %v443_v42  ;;  %v1083_v51 = vld [vmem:[%s1449_s0 + $0x34] sm:$0xf] }
 0x1f7   :  { %v404_v28 = vrot.slane %v403_v22, 1 }
 0x1f8   :  { %v431_v36 = vadd.f32 %v1094_v21, %v430_v26  ;;  %v446_v62 = vrot.slane %v445_v54, 1  ;;  %v1082_v26 = vld [vmem:[%s1449_s0 + $0x24] sm:$0xf0] }
 0x1f9   :  { %v405_v37 = vmax.f32 %v403_v22, %v404_v28 }
 0x1fa   :  { %v432_v40 = vrot.slane %v431_v36, 2  ;;  %v447_v11 = vadd.f32 %v446_v62, %v445_v54  ;;  %v1043_v54 = vld [vmem:[%s1449_s0 + $0x38] sm:$0xf0] }
 0x1fb   :  { %v414_v41 = vsub.f32 %v371_v12, %v405_v37  ;;  %v261_v12 = vpack.c.bf16 %v244_v63, %v244_v63  ;;  %v250_v37 = vpop.f32.mrf.mxu2  ;;  %v1046_v62 = vor.u32 %v1083_v51, %v1043_v54 }
 0x1fc   :  { %v433_v45 = vadd.f32 %v432_v40, %v431_v36  ;;  %v1034_v36 = vor.u32 %v1082_v26, %v1033_v23 }
 0x1fd   :  { %v420_v46 = vmul.f32 1.442695, %v414_v41  ;;  %v460_v27 = vunpack.c.l.b16 %v261_v12  ;;  %v1327_v41 = vpop.permute.xlu2 %185 }
 0x1fe   :  { %v434_v48 = vrot.slane %v433_v45, 1  ;;  %v251_v42 = vadd.f32 %v250_v37, %v1327_v41 }
 0x1ff   :  { %1095 = vpow2.f32 %v420_v46  ;;  %v462_v34 = vpack.c.b16 %v461_v16, %v460_v27 }
 0x200   :  { %v435_v50 = vadd.f32 %v434_v48, %v433_v45  ;;  %1097 = vrcp.f32 %v429_v44  ;;  %v249_v45 = vadd.f32 %v248_v3, %v1309_v7  ;;  %v264_v49 = vpack.c.bf16 %v251_v42, %v251_v42 }
 0x202   :  { %1099 = vrcp.f32 %v435_v50 }
 0x203   :  { %1101 = vrcp.f32 %v447_v11 }
 0x205   :  { %v1096_v55 = vpop.eup %1095 }
 0x206   :  { %v1098_v56 = vpop.eup %1097  ;;  %v436_v57 = vrot.slane %v1096_v55, 4 }
 0x207   :  { %v452_v0 = vmul.f32 %v1098_v56, %v1090_v1  ;;  %v1030_v56 = vld [vmem:[%s1447_s1 + $0x4] sm:$0xf] }
 0x208   :  { %v1100_v60 = vpop.eup %1099  ;;  %v437_v61 = vadd.f32 %v1096_v55, %v436_v57  ;;  %v263_v57 = vpack.c.bf16 %v249_v45, %v249_v45  ;;  %v628_v63 = vsel %vm208_vm0, %v1030_v56, 0 }
 0x209   :  { %v453_v2 = vmul.f32 %v1100_v60, %v1094_v21  ;;  %v1042_v21 = vor.u32 %v1084_v9, %v1041_v8  ;;  %v1102_v40 = vpop.eup %1101 }
 0x20a   :  { %v438_v4 = vrot.slane %v437_v61, 2  ;;  %v455_v48 = vmul.f32 %v1102_v40, %v1299_v18  ;;  %v509_v3 = vunpack.c.l.b16 %v263_v57 }
 0x20b   :  { %v456_v6 = vpack.c.bf16 %v453_v2, %v452_v0  ;;  %v1081_v0 = vld [vmem:[%s1449_s0 + $0x24] sm:$0xf]  ;;  %v1035_v2 = vld [vmem:[%s1449_s0 + $0x28] sm:$0xf0] }
 0x20c   :  { %v439_v10 = vadd.f32 %v438_v4, %v437_v61  ;;  %v1038_v8 = vor.u32 %v1081_v0, %v1035_v2 }
 0x20d   :  { %v464_v13 = vunpack.c.l.b16 %v456_v6  ;;  %v465_v1 = vunpack.c.h.b16 %v456_v6 }
 0x20e   :  { %v440_v15 = vrot.slane %v439_v10, 1 }
 0x20f   :  { %v466_v17 = vpack.c.b16 %v464_v13, %v464_v13  ;;  %v467_v20 = vpack.c.b16 %v465_v1, %v465_v1 }
 0x210   :  { %v441_v22 = vadd.f32 %v440_v15, %v439_v10 }
 0x211   :  { %v474_v28 = vsel %vm472_vm3, %v466_v17, 0  ;;  %v477_v31 = vsel %vm472_vm3, %v467_v20, 0 }
 0x212   :  { %486 = vmatpush.bf16.msrb.mxu1 %v474_v28  ;;  %500 = vmatpush.bf16.msrb.mxu3 %v477_v31  ;;  %1103 = vrcp.f32 %v441_v22 }
 0x215   :  { %1022 = vmatmul.msk.bf16.vlgmr.msrb.gmra.mxu1 %vm468_vm4, %v462_v34  ;;  %1023 = vmatmul.msk.bf16.vlgmr.msrb.gmra.mxu3 %vm468_vm4, %v462_v34 }
 0x216   :  { %595 = vmatpush.bf16.msra.mxu3 %v1042_v21 }
 0x218   :  { %v1104_v44 = vpop.eup %1103 }
 0x219   :  { %v454_v46 = vmul.f32 %v1104_v44, %v1096_v55  ;;  %v510_v55 = vunpack.c.l.b16 %v264_v49 }
 0x21a   :  { %596 = vmatpush.bf16.msra.mxu3 %v1034_v36 }
 0x21b   :  { %v457_v50 = vpack.c.bf16 %v455_v48, %v454_v46  ;;  %v511_v6 = vpack.c.b16 %v510_v55, %v509_v3 }
 0x21d   :  { %v513_v58 = vunpack.c.l.b16 %v457_v50  ;;  %v514_v60 = vunpack.c.h.b16 %v457_v50 }
 0x21f   :  { %v515_v61 = vpack.c.b16 %v513_v58, %v513_v58  ;;  %v516_v18 = vpack.c.b16 %v514_v60, %v514_v60 }
 0x221   :  { %v521_v4 = vsel %vm472_vm3, %v515_v61, 0  ;;  %v524_v5 = vsel %vm472_vm3, %v516_v18, 0 }
 0x222   :  { %533 = vmatpush.bf16.msra.mxu0 %v521_v4  ;;  %547 = vmatpush.bf16.msra.mxu1 %v524_v5 }
 0x225   :  { %1024 = vmatmul.msk.bf16.vlgmr.msra.gmra.mxu0 %vm468_vm4, %v511_v6  ;;  %1025 = vmatmul.msk.bf16.vlgmr.msra.gmra.mxu1 %vm468_vm4, %v511_v6 }
 0x226   :  { %614 = vmatpush.bf16.msrb.mxu0 %v1046_v62  ;;  %637 = vmatpush.bf16.xpose.msrb.mxu1 %v628_v63 }
 0x227   :  { %1047 = vmatmul.msk.bf16.vlgmr.msra.gmra.mxu3 %vm103_vm1, %v1202_v19 }
 0x22a   :  { %615 = vmatpush.bf16.msrb.mxu0 %v1038_v8 }
 0x235   :  { %1049 = vmatmul.msk.bf16.vlgmr.msrb.gmra.mxu0 %vm103_vm1, %v1202_v19  ;;  %1051 = vmatmul.msk.bf16.vlgmr.msrb.gmra.mxu1 %vm208_vm0, %v1191_v14 }
 0x237   :  { %1048 = vmatmul.msk.bf16.gmra.mxu3 %vm103_vm1, %v1230_v25 }
 0x245   :  { %1050 = vmatmul.msk.bf16.gmra.mxu0 %vm103_vm1, %v1230_v25  ;;  %1052 = vmatmul.msk.bf16.gmra.mxu1 %vm208_vm0, %v1225_v24 }
 0x255   :  { %1053 = vmatmul.msk.bf16.gmra.mxu1 %vm208_vm0, %v1250_v29 }
 0x265   :  { %1054 = vmatmul.msk.bf16.gmra.mxu1 %vm208_vm0, %v1263_v32 }
 0x292   :  { %v488_v9 = vpop.f32.mrf.mxu1 }
 0x293   :  { %554 = vst [vmem:[%s1453_s6] sm:$0xff] %v488_v9 }
 0x298   :  { %v502_v14 = vpop.f32.mrf.mxu3 }
 0x299   :  { %555 = vst [vmem:[%s1453_s6 + $0x8] sm:$0xff] %v502_v14 }
 0x29a   :  { %v490_v19 = vpop.f32.mrf.mxu1 }
 0x29b   :  { %556 = vst [vmem:[%s1453_s6 + $0x10] sm:$0xff] %v490_v19 }
 0x2a0   :  { %v504_v24 = vpop.f32.mrf.mxu3 }
 0x2a1   :  { %557 = vst [vmem:[%s1453_s6 + $0x18] sm:$0xff] %v504_v24 }
 0x2a2   :  { %v535_v25 = vpop.f32.mrf.mxu0  ;;  %v549_v29 = vpop.f32.mrf.mxu1 }
 0x2a3   :  { %558 = vst [vmem:[%s1453_s6 + $0x20] sm:$0xff] %v535_v25 }
 0x2a4   :  { %559 = vst [vmem:[%s1453_s6 + $0x28] sm:$0xff] %v549_v29 }
 0x2aa   :  { %v598_v32 = vpop.f32.mrf.mxu3  ;;  %v537_v10 = vpop.f32.mrf.mxu0 }
 0x2ab   :  { %v551_v11 = vpop.f32.mrf.mxu1  ;;  %560 = vst [vmem:[%s1453_s6 + $0x30] sm:$0xff] %v537_v10  ;;  %v599_v17 = vadd.f32 %v598_v32, %v1267_v33 }
 0x2ac   :  { %561 = vst [vmem:[%s1453_s6 + $0x38] sm:$0xff] %v551_v11 }
 0x2b2   :  { %v617_v12 = vpop.f32.mrf.mxu0  ;;  %v600_v1 = vpop.f32.mrf.mxu3 }
 0x2b3   :  { %v639_v13 = vpop.f32.mrf.mxu1  ;;  %v618_v15 = vadd.f32 %v617_v12, %v1267_v33  ;;  %v601_v26 = vadd.f32 %v600_v1, %v1273_v39 }
 0x2b4   :  { %v640_v16 = vadd.f32 %v639_v13, %v1269_v35 }
 0x2b5   :  { %v659_v20 = vpack.c.bf16 %v618_v15, %v599_v17 }
 0x2b6   :  { %v663_v21 = vpack.c.bf16 %v640_v16, %v640_v16 }
 0x2b7   :  { %v696_v36 = vunpack.c.h.b16 %v659_v20  ;;  %v695_v35 = vunpack.c.l.b16 %v659_v20 }
 0x2b8   :  { %v673_v37 = vunpack.c.l.b16 %v663_v21 }
 0x2ba   :  { %v619_v22 = vpop.f32.mrf.mxu0  ;;  %v603_v40 = vpop.f32.mrf.mxu3 }
 0x2bb   :  { %v641_v23 = vpop.f32.mrf.mxu1  ;;  %v620_v27 = vadd.f32 %v619_v22, %v1273_v39  ;;  %v604_v51 = vadd.f32 %v603_v40, %v1281_v53 }
 0x2bc   :  { %v642_v28 = vadd.f32 %v641_v23, %v1276_v43 }
 0x2bd   :  { %v660_v31 = vpack.c.bf16 %v620_v27, %v601_v26 }
 0x2be   :  { %v664_v34 = vpack.c.bf16 %v642_v28, %v642_v28 }
 0x2bf   :  { %v698_v42 = vunpack.c.h.b16 %v660_v31  ;;  %v697_v45 = vunpack.c.l.b16 %v660_v31 }
 0x2c0   :  { %v674_v44 = vunpack.c.l.b16 %v664_v34 }
 0x2c1   :  { %v700_v33 = vpack.c.b16 %v698_v42, %v696_v36  ;;  %v699_v48 = vpack.c.b16 %v697_v45, %v695_v35 }
 0x2c2   :  { %v675_v46 = vpack.c.b16 %v674_v44, %v673_v37  ;;  %v622_v49 = vpop.f32.mrf.mxu0  ;;  %v605_v54 = vpop.f32.mrf.mxu3 }
 0x2c3   :  { %v644_v50 = vpop.f32.mrf.mxu1  ;;  %713 = vmatpush.bf16.msrb.mxu2 %v699_v48  ;;  %v623_v39 = vadd.f32 %v622_v49, %v1281_v53  ;;  %v606_v60 = vadd.f32 %v605_v54, %v1286_v59 }
 0x2c4   :  { %677 = vxpose.xlu0.c.b16.start.end [1/1] (short) (narrow) %v675_v46, 16  ;;  %v645_v43 = vadd.f32 %v644_v50, %v1271_v38 }
 0x2c5   :  { %v661_v56 = vpack.c.bf16 %v623_v39, %v604_v51 }
 0x2c6   :  { %v665_v55 = vpack.c.bf16 %v645_v43, %v645_v43 }
 0x2c7   :  { %726 = vmatpush.bf16.msra.mxu2 %v700_v33  ;;  %v756_v0 = vunpack.c.l.b16 %v661_v56  ;;  %v757_v2 = vunpack.c.h.b16 %v661_v56 }
 0x2c8   :  { %v734_v3 = vunpack.c.l.b16 %v665_v55 }
 0x2ca   :  { %v624_v57 = vpop.f32.mrf.mxu0 }
 0x2cb   :  { %v646_v58 = vpop.f32.mrf.mxu1  ;;  %v625_v61 = vadd.f32 %v624_v57, %v1286_v59 }
 0x2cc   :  { %v647_v18 = vadd.f32 %v646_v58, %v1279_v47 }
 0x2cd   :  { %v662_v62 = vpack.c.bf16 %v625_v61, %v606_v60 }
 0x2ce   :  { %v666_v63 = vpack.c.bf16 %v647_v18, %v647_v18 }
 0x2cf   :  { %v758_v4 = vunpack.c.l.b16 %v662_v62  ;;  %v759_v38 = vunpack.c.h.b16 %v662_v62 }
 0x2d0   :  { %v735_v5 = vunpack.c.l.b16 %v666_v63 }
 0x2d1   :  { %v760_v53 = vpack.c.b16 %v758_v4, %v756_v0  ;;  %v761_v6 = vpack.c.b16 %v759_v38, %v757_v2 }
 0x2d2   :  { %v736_v8 = vpack.c.b16 %v735_v5, %v734_v3 }
 0x2d3   :  { %774 = vmatpush.bf16.msrb.mxu3 %v760_v53  ;;  %787 = vmatpush.bf16.msra.mxu0 %v761_v6  ;;  %v1408_v31 = vpop.f32.mrf.mxu1 }
 0x2d4   :  { %738 = vxpose.xlu2.c.b16.start.end [1/1] (short) (narrow) %v736_v8, 16 }
 0x2db   :  { %v651_v43 = vpop.f32.mrf.mxu1 }
 0x2e3   :  { %v654_v5 = vpop.f32.mrf.mxu1 }
 0x370   :  { %v685_v9 = vpop.trf.xlu0 }
 0x371   :  { %1055 = vmatmul.msk.bf16.vlgmr.msrb.gmra.mxu2 %vm297_vm2, %v685_v9 }
 0x375   :  { %v746_v59 = vpop.trf.xlu2 }
 0x376   :  { %1057 = vmatmul.msk.bf16.vlgmr.msrb.gmra.mxu3 %vm297_vm2, %v746_v59  ;;  %1058 = vmatmul.msk.bf16.vlgmr.msra.gmra.mxu0 %vm297_vm2, %v746_v59 }
 0x381   :  { %1056 = vmatmul.msk.bf16.vlgmr.msra.gmra.mxu2 %vm297_vm2, %v685_v9 }
 0x3f3   :  { %v789_v47 = vpop.f32.mrf.mxu0 }
 0x3f4   :  { %v715_v14 = vpop.f32.mrf.mxu2  ;;  %v811_v19 = vrot.slane %v789_v47, 4 }
 0x3f5   :  { %v793_v24 = vrot.slane %v715_v14, 4 }
 0x3f6   :  { %v812_v25 = vmax.f32 %v789_v47, %v811_v19 }
 0x3f7   :  { %v794_v29 = vmax.f32 %v715_v14, %v793_v24 }
 0x3f8   :  { %v813_v32 = vrot.slane %v812_v25, 2 }
 0x3f9   :  { %v795_v10 = vrot.slane %v794_v29, 2  ;;  %v776_v11 = vpop.f32.mrf.mxu3 }
 0x3fa   :  { %v805_v12 = vrot.slane %v776_v11, 4  ;;  %v814_v13 = vmax.f32 %v812_v25, %v813_v32  ;;  %v656_v32 = vpop.f32.mrf.mxu1 }
 0x3fb   :  { %v796_v1 = vmax.f32 %v794_v29, %v795_v10  ;;  %v791_v15 = vpop.f32.mrf.mxu0 }
 0x3fc   :  { %v806_v16 = vmax.f32 %v776_v11, %v805_v12  ;;  %v815_v17 = vrot.slane %v814_v13, 1  ;;  %v717_v20 = vpop.f32.mrf.mxu2  ;;  %v657_v12 = vadd.f32 %v656_v32, %v1327_v41 }
 0x3fd   :  { %v797_v21 = vrot.slane %v796_v1, 1 }
 0x3fe   :  { %v807_v22 = vrot.slane %v806_v16, 2  ;;  %v816_v23 = vmax.f32 %v814_v13, %v815_v17 }
 0x3ff   :  { %v798_v26 = vmax.f32 %v796_v1, %v797_v21 }
 0x400   :  { %v808_v27 = vmax.f32 %v806_v16, %v807_v22  ;;  %v820_v28 = vsub.f32 %v789_v47, %v816_v23  ;;  %v655_v16 = vadd.f32 %v654_v5, %v1309_v7  ;;  %v670_v22 = vpack.c.bf16 %v657_v12, %v657_v12 }
 0x401   :  { %v817_v34 = vsub.f32 %v715_v14, %v798_v26  ;;  %v778_v36 = vpop.f32.mrf.mxu3 }
 0x402   :  { %v809_v37 = vrot.slane %v808_v27, 1  ;;  %v827_v40 = vmul.f32 1.442695, %v820_v28 }
 0x403   :  { %v821_v42 = vmul.f32 1.442695, %v817_v34  ;;  %v913_v34 = vunpack.c.l.b16 %v670_v22 }
 0x404   :  { %v810_v44 = vmax.f32 %v808_v27, %v809_v37  ;;  %1105 = vpow2.f32 %v827_v40  ;;  %v728_v35 = vpop.f32.mrf.mxu2  ;;  %v669_v27 = vpack.c.bf16 %v655_v16, %v655_v16 }
 0x405   :  { %1107 = vpow2.f32 %v821_v42  ;;  %v799_v45 = vrot.slane %v728_v35, 4  ;;  %v652_v42 = vadd.f32 %v651_v43, %v1305_v52 }
 0x406   :  { %v819_v33 = vsub.f32 %v776_v11, %v810_v44  ;;  %v912_v40 = vunpack.c.l.b16 %v669_v27 }
 0x407   :  { %v800_v46 = vmax.f32 %v728_v35, %v799_v45 }
 0x408   :  { %v825_v48 = vmul.f32 1.442695, %v819_v33  ;;  %v914_v44 = vpack.c.b16 %v913_v34, %v912_v40 }
 0x409   :  { %v801_v49 = vrot.slane %v800_v46, 2 }
 0x40a   :  { %v1106_v50 = vpop.eup %1105  ;;  %1109 = vpow2.f32 %v825_v48  ;;  %v668_v48 = vpack.c.bf16 %v652_v42, %v652_v42 }
 0x40b   :  { %v1108_v39 = vpop.eup %1107  ;;  %v847_v51 = vrot.slane %v1106_v50, 4  ;;  %v802_v54 = vmax.f32 %v800_v46, %v801_v49 }
 0x40c   :  { %v730_v56 = vpop.f32.mrf.mxu2  ;;  %v829_v60 = vrot.slane %v1108_v39, 4 }
 0x40d   :  { %v848_v57 = vadd.f32 %v1106_v50, %v847_v51  ;;  %v803_v58 = vrot.slane %v802_v54, 1 }
 0x40e   :  { %v830_v2 = vadd.f32 %v1108_v39, %v829_v60 }
 0x40f   :  { %v804_v55 = vmax.f32 %v802_v54, %v803_v58  ;;  %v849_v61 = vrot.slane %v848_v57, 2 }
 0x410   :  { %v1110_v18 = vpop.eup %1109  ;;  %v831_v6 = vrot.slane %v830_v2, 2 }
 0x411   :  { %v841_v62 = vrot.slane %v1110_v18, 4  ;;  %v818_v63 = vsub.f32 %v728_v35, %v804_v55  ;;  %v850_v0 = vadd.f32 %v849_v61, %v848_v57  ;;  %v650_v35 = vadd.f32 %v1408_v31, %v1301_v30 }
 0x412   :  { %v832_v47 = vadd.f32 %v831_v6, %v830_v2  ;;  %v866_v57 = vunpack.c.l.b16 %v668_v48 }
 0x413   :  { %v842_v3 = vadd.f32 %v1110_v18, %v841_v62  ;;  %v823_v4 = vmul.f32 1.442695, %v818_v63  ;;  %v851_v38 = vrot.slane %v850_v0, 1 }
 0x414   :  { %v833_v29 = vrot.slane %v832_v47, 1 }
 0x415   :  { %1111 = vpow2.f32 %v823_v4  ;;  %v843_v53 = vrot.slane %v842_v3, 2  ;;  %v852_v9 = vadd.f32 %v851_v38, %v850_v0 }
 0x416   :  { %v834_v13 = vadd.f32 %v833_v29, %v832_v47 }
 0x417   :  { %v844_v8 = vadd.f32 %v843_v53, %v842_v3  ;;  %1113 = vrcp.f32 %v852_v9 }
 0x419   :  { %v845_v59 = vrot.slane %v844_v8, 1 }
 0x41b   :  { %v1112_v14 = vpop.eup %1111  ;;  %v846_v19 = vadd.f32 %v845_v59, %v844_v8 }
 0x41c   :  { %v835_v24 = vrot.slane %v1112_v14, 4 }
 0x41d   :  { %1115 = vrcp.f32 %v846_v19  ;;  %v1114_v11 = vpop.eup %1113 }
 0x41e   :  { %v836_v25 = vadd.f32 %v1112_v14, %v835_v24  ;;  %v860_v20 = vmul.f32 %v1114_v11, %v1106_v50  ;;  %1117 = vrcp.f32 %v834_v13  ;;  %v667_v50 = vpack.c.bf16 %v650_v35, %v650_v35 }
 0x420   :  { %v837_v10 = vrot.slane %v836_v25, 2  ;;  %v865_v43 = vunpack.c.l.b16 %v667_v50 }
 0x422   :  { %v838_v1 = vadd.f32 %v837_v10, %v836_v25  ;;  %v867_v31 = vpack.c.b16 %v866_v57, %v865_v43 }
 0x423   :  { %v1116_v15 = vpop.eup %1115 }
 0x424   :  { %v859_v17 = vmul.f32 %v1116_v15, %v1110_v18  ;;  %v839_v21 = vrot.slane %v838_v1, 1  ;;  %v1118_v37 = vpop.eup %1117 }
 0x425   :  { %v857_v45 = vmul.f32 %v1118_v37, %v1108_v39 }
 0x426   :  { %v862_v23 = vpack.c.bf16 %v860_v20, %v859_v17  ;;  %v840_v26 = vadd.f32 %v839_v21, %v838_v1 }
 0x428   :  { %v916_v28 = vunpack.c.l.b16 %v862_v23  ;;  %1119 = vrcp.f32 %v840_v26  ;;  %v917_v46 = vunpack.c.h.b16 %v862_v23 }
 0x42a   :  { %v918_v36 = vpack.c.b16 %v916_v28, %v916_v28  ;;  %v919_v56 = vpack.c.b16 %v917_v46, %v917_v46 }
 0x42c   :  { %v924_v41 = vsel %vm472_vm3, %v918_v36, 0  ;;  %v927_v30 = vsel %vm472_vm3, %v919_v56, 0 }
 0x42d   :  { %936 = vmatpush.bf16.msrb.mxu0 %v924_v41 }
 0x42e   :  { %v1120_v7 = vpop.eup %1119 }
 0x42f   :  { %v858_v33 = vmul.f32 %v1120_v7, %v1112_v14 }
 0x430   :  { %1061 = vmatmul.msk.bf16.vlgmr.msrb.gmra.mxu0 %vm468_vm4, %v914_v44 }
 0x431   :  { %v861_v49 = vpack.c.bf16 %v858_v33, %v857_v45 }
 0x433   :  { %v869_v51 = vunpack.c.l.b16 %v861_v49  ;;  %v870_v54 = vunpack.c.h.b16 %v861_v49 }
 0x435   :  { %v871_v58 = vpack.c.b16 %v869_v51, %v869_v51  ;;  %v872_v52 = vpack.c.b16 %v870_v54, %v870_v54 }
 0x437   :  { %v877_v60 = vsel %vm472_vm3, %v871_v58, 0  ;;  %v880_v55 = vsel %vm472_vm3, %v872_v52, 0 }
 0x438   :  { %889 = vmatpush.bf16.msrb.mxu2 %v877_v60  ;;  %903 = vmatpush.bf16.msra.mxu3 %v880_v55 }
 0x43b   :  { %1059 = vmatmul.msk.bf16.vlgmr.msrb.gmra.mxu2 %vm468_vm4, %v867_v31  ;;  %1060 = vmatmul.msk.bf16.vlgmr.msra.gmra.mxu3 %vm468_vm4, %v867_v31 }
 0x43c   :  { %950 = vmatpush.bf16.msra.mxu2 %v927_v30 }
 0x44b   :  { %1062 = vmatmul.msk.bf16.vlgmr.msra.gmra.mxu2 %vm468_vm4, %v914_v44 }
 0x4ad   :  { %v938_v39 = vpop.f32.mrf.mxu0 }
 0x4ae   :  { %1067 = vst [vmem:[%s1453_s6 + $0x60] sm:$0xff] %v938_v39 }
 0x4b5   :  { %v940_v61 = vpop.f32.mrf.mxu0 }
 0x4b6   :  { %1069 = vst [vmem:[%s1453_s6 + $0x70] sm:$0xff] %v940_v61 }
 0x4be   :  { %v891_v18 = vpop.f32.mrf.mxu2  ;;  %v905_v62 = vpop.f32.mrf.mxu3 }
 0x4bf   :  { %1063 = vst [vmem:[%s1453_s6 + $0x40] sm:$0xff] %v891_v18 }
 0x4c0   :  { %1064 = vst [vmem:[%s1453_s6 + $0x48] sm:$0xff] %v905_v62 }
 0x4c6   :  { %v893_v63 = vpop.f32.mrf.mxu2  ;;  %v907_v0 = vpop.f32.mrf.mxu3 }
 0x4c7   :  { %1065 = vst [vmem:[%s1453_s6 + $0x50] sm:$0xff] %v893_v63 }
 0x4c8   :  { %1066 = vst [vmem:[%s1453_s6 + $0x58] sm:$0xff] %v907_v0 }
 0x4ce   :  { %v952_v2 = vpop.f32.mrf.mxu2 }
 0x4cf   :  { %1068 = vst [vmem:[%s1453_s6 + $0x68] sm:$0xff] %v952_v2 }
 0x4d6   :  { %v954_v3 = vpop.f32.mrf.mxu2 }
 0x4d7   :  { %1070 = vst [vmem:[%s1453_s6 + $0x78] sm:$0xff] %v954_v3 }

</bundles_post_ra>
